<compile_context>
chip_gen: v7x
topology: tpu7x:2x2x1
jax: 0.10.0
libtpu: 0.0.40
codegen_flags: <defaults>
</compile_context>

<pallas_src>
import functools

import jax
import jax.numpy as jnp
import numpy as np
from jax.experimental import pallas as pl
from jax.experimental.pallas import tpu as pltpu


# ----------------------------------------------------------------------------
# Fused kernel: cv1 (1x1) -> n x (3x3) -> residual add, channels-first (C, H*W).
# One grid step = b_blk batch elements.
# ----------------------------------------------------------------------------
def _c1_fused_kernel(x_ref, w1_ref, b1_ref, w2_ref, b2_ref, o_ref, ycat_ref,
                     *, H, W, n, b_blk):
    HW = H * W
    c2 = w1_ref.shape[0]

    # Boundary-validity masks for the 9 taps, built once: a single sublane row
    # (1, HW) per tap, kept as f32 {0,1} planes and applied by multiply.
    pos = jax.lax.broadcasted_iota(jnp.int32, (1, HW), 1)
    if (W & (W - 1)) == 0:                          # power-of-two fast path
        col = jnp.bitwise_and(pos, W - 1)
    else:
        col = pos % W
    h_ok = {-1: pos >= W, 0: None, 1: pos < (H - 1) * W}
    w_ok = {-1: col > 0, 0: None, 1: col < (W - 1)}
    tap_mask = {}
    for dh in (-1, 0, 1):
        for dw in (-1, 0, 1):
            mks = [m for m in (h_ok[dh], w_ok[dw]) if m is not None]
            if not mks:
                tap_mask[(dh, dw)] = None
            else:
                mk = mks[0] if len(mks) == 1 else mks[0] & mks[1]
                tap_mask[(dh, dw)] = mk.astype(jnp.float32)

    def silu(z):
        # exp -> EUP, approx reciprocal -> EUP; keeps the VALU slot free.
        return z * pl.reciprocal(1.0 + jnp.exp(-z), approx=True)

    for b in range(b_blk):
        # cv1: 1x1 conv == channel matmul.  Input cast f32->bf16 happens here
        # (in-kernel, under MXU slack) instead of as a separate XLA pass.
        xb = x_ref[b].astype(jnp.bfloat16)          # (c_in, HW) bf16
        y = jnp.dot(w1_ref[...], xb, preferred_element_type=jnp.float32)
        y = silu(y + b1_ref[...])                   # (c2, HW) f32

        # m: n x (3x3 conv + bias + SiLU).  Each 3x3 conv is a single deep-K
        # matmul; the 9 rolled+masked taps are staged into the VMEM scratch
        # one at a time (no concatenate, no 9-piece live set).
        cur = y
        for layer in range(n):
            cur_bf = cur.astype(jnp.bfloat16)       # center tap, cast once
            t = 0
            for dh in (-1, 0, 1):
                for dw in (-1, 0, 1):
                    d = dh * W + dw                 # flat spatial shift
                    mk = tap_mask[(dh, dw)]
                    if d == 0:
                        tap = cur_bf
                    else:
                        sh = pltpu.roll(cur, (-d) % HW, axis=1)   # XLU
                        if mk is not None:
                            sh = sh * mk            # (1,HW) mask, broadcast mul
                        tap = sh.astype(jnp.bfloat16)
                    ycat_ref[t * c2:(t + 1) * c2, :] = tap
                    t += 1
            # K = 9*c2 deep matmul straight out of scratch.  (On v7x the MRB
            # would also make 9 accumulating shallow dots viable.)
            z = jnp.dot(w2_ref[layer], ycat_ref[...],
                        preferred_element_type=jnp.float32)
            cur = silu(z + b2_ref[layer])           # f32

        # Residual add (f32) + lane-dense store (last dim = HW).
        o_ref[b] = (cur + y).astype(o_ref.dtype)


# ----------------------------------------------------------------------------
# Wrapper
# ----------------------------------------------------------------------------
@functools.partial(jax.jit, static_argnames=("b_blk",))
def c1_forward(x_nchw, params, *, b_blk=1):
    """C1.forward: x (N, c1, H, W) f32 -> (N, c2, H, W) f32.

    b_blk: images per grid step.  Keep 1 (>=2 grid steps) so v7x's two
    TensorCores both get work; raise on single-TC v5e/v6e to amortize the
    per-step overhead and the MXU weight push.
    """
    N, c_in, H, W = x_nchw.shape
    c2 = params["w1"].shape[0]
    n = params["w2"].shape[0]
    HW = H * W
    assert N % b_blk == 0, "batch must divide b_blk"

    # Free reshape (no transpose, no cast): channels in sublanes, flattened
    # spatial positions in lanes.  The bf16 cast happens inside the kernel.
    x_flat = x_nchw.reshape(N, c_in, HW)

    kernel = functools.partial(_c1_fused_kernel, H=H, W=W, n=n, b_blk=b_blk)
    out = pl.pallas_call(
        kernel,
        out_shape=jax.ShapeDtypeStruct((N, c2, HW), jnp.float32),
        grid=(N // b_blk,),
        in_specs=[
            pl.BlockSpec((b_blk, c_in, HW), lambda i: (i, 0, 0)),
            pl.BlockSpec((c2, c_in), lambda i: (0, 0)),
            pl.BlockSpec((c2, 1), lambda i: (0, 0)),
            pl.BlockSpec((n, c2, 9 * c2), lambda i: (0, 0, 0)),
            pl.BlockSpec((n, c2, 1), lambda i: (0, 0, 0)),
        ],
        out_specs=pl.BlockSpec((b_blk, c2, HW), lambda i: (i, 0, 0)),
        scratch_shapes=[pltpu.VMEM((9 * c2, HW), jnp.bfloat16)],  # deep-K stage
        compiler_params=pltpu.CompilerParams(
            dimension_semantics=("parallel",)),     # batch across v7x's 2 TCs
    )(x_flat, params["w1"], params["b1"], params["w2"], params["b2"])
    return out.reshape(N, c2, H, W)                 # free reshape, already NCHW


# ----------------------------------------------------------------------------
# Parameter construction (deterministic, BN folded — ultralytics Conv has
# bias=False, BatchNorm2d(eps=1e-3), SiLU activation).
# ----------------------------------------------------------------------------
def make_conv_bn_params(key, c_in, c_out, k):
    kw_, kg, kb, km, kv = jax.random.split(key, 5)
    w = jax.random.normal(kw_, (c_out, c_in, k, k), jnp.float32) * 0.1
    gamma = jax.random.uniform(kg, (c_out,), minval=0.5, maxval=1.5)
    beta = jax.random.normal(kb, (c_out,)) * 0.1
    mean = jax.random.normal(km, (c_out,)) * 0.1
    var = jax.random.uniform(kv, (c_out,), minval=0.5, maxval=1.5)
    eps = 1e-3
    scale = gamma / jnp.sqrt(var + eps)
    return w * scale[:, None, None, None], beta - mean * scale


def init_c1_params(key, c1, c2, n=1):
    keys = jax.random.split(key, n + 1)
    w1, b1 = make_conv_bn_params(keys[0], c1, c2, 1)
    w2_list, b2_list = [], []
    for i in range(n):
        w, b = make_conv_bn_params(keys[i + 1], c2, c2, 3)
        w2_list.append(w)
        b2_list.append(b)

    kernel_params = {
        # 1x1: (c2, c1) bf16
        "w1": w1[:, :, 0, 0].astype(jnp.bfloat16),
        "b1": b1.reshape(c2, 1),
        # 3x3: (n, c2, 9*c2) bf16, K laid out as (kh, kw, c_in) to match the
        # tap enumeration order (dh outer, dw inner) inside the kernel.
        "w2": jnp.stack([w.transpose(0, 2, 3, 1).reshape(c2, 9 * c2)
                         for w in w2_list]).astype(jnp.bfloat16),
        "b2": jnp.stack([b.reshape(c2, 1) for b in b2_list]),
    }
    torch_params = {"w1": w1, "b1": b1, "w2": w2_list, "b2": b2_list}
    return kernel_params, torch_params


# ----------------------------------------------------------------------------
# Pure-JAX reference (mirrors the kernel's bf16 casts so only accumulation
# order / transcendental implementation differ).
# ----------------------------------------------------------------------------
def _bf16_roundtrip(x):
    return x.astype(jnp.bfloat16).astype(jnp.float32)


def c1_reference(x_nchw, torch_params):
    def conv_bn_silu(x, w, b, pad):
        y = jax.lax.conv_general_dilated(
            _bf16_roundtrip(x), _bf16_roundtrip(w),
            window_strides=(1, 1), padding=[(pad, pad), (pad, pad)],
            dimension_numbers=("NCHW", "OIHW", "NCHW"),
            precision=jax.lax.Precision.HIGHEST)
        y = y + b.reshape(1, -1, 1, 1)
        return y * jax.nn.sigmoid(y)

    y = conv_bn_silu(x_nchw, torch_params["w1"], torch_params["b1"], 0)
    cur = y
    for w, b in zip(torch_params["w2"], torch_params["b2"]):
        cur = conv_bn_silu(cur, w, b, 1)
    return cur + y


if __name__ == "__main__":
    key = jax.random.PRNGKey(0)
    kx, kp = jax.random.split(key)

    # Small shapes consistent with C1: batch=2, c1=16 -> c2=32, 16x16 spatial
    # (H*W = 256, a lane-dense multiple of 128), n=1 (module default).
    N, C1_IN, C2_OUT, H, W = 2, 16, 32, 16, 16
    x = jax.random.normal(kx, (N, C1_IN, H, W), jnp.float32)
    params, torch_params = init_c1_params(kp, C1_IN, C2_OUT, n=1)

    out = c1_forward(x, params)
    jax.block_until_ready(out)
    assert out.shape == (N, C2_OUT, H, W)

    ref = c1_reference(x, torch_params)
    np.testing.assert_allclose(np.asarray(out), np.asarray(ref),
                               rtol=1e-2, atol=1e-2)
    print("KERNEL_OK")
</pallas_src>

<mosaic_0001>
module attributes {stable_mosaic.version = 11 : i64} {
  func.func @_c1_fused_kernel(%arg0: i32, %arg1: memref<1x16x256xf32, #tpu.memory_space<vmem>>, %arg2: memref<32x16xbf16, #tpu.memory_space<vmem>>, %arg3: memref<32x1xf32, #tpu.memory_space<vmem>>, %arg4: memref<1x32x288xbf16, #tpu.memory_space<vmem>>, %arg5: memref<1x32x1xf32, #tpu.memory_space<vmem>>, %arg6: memref<1x32x256xf32, #tpu.memory_space<vmem>>, %arg7: memref<288x256xbf16, #tpu.memory_space<vmem>>) attributes {dimension_semantics = [#tpu.dimension_semantics<parallel>], iteration_bounds = array<i64: 2>, scalar_prefetch = 0 : i64, scratch_operands = 1 : i64, tpu.core_type = #tpu.core_type<tc>, window_params = [{transform_indices = @transform_0, window_bounds = array<i64: 1, 16, 256>}, {pipeline_mode = #tpu.pipeline_mode<synchronous>, transform_indices = @transform_1, window_bounds = array<i64: 32, 16>}, {pipeline_mode = #tpu.pipeline_mode<synchronous>, transform_indices = @transform_2, window_bounds = array<i64: 32, 1>}, {pipeline_mode = #tpu.pipeline_mode<synchronous>, transform_indices = @transform_3, window_bounds = array<i64: 1, 32, 288>}, {pipeline_mode = #tpu.pipeline_mode<synchronous>, transform_indices = @transform_4, window_bounds = array<i64: 1, 32, 1>}, {transform_indices = @transform_5, window_bounds = array<i64: 1, 32, 256>}]} {
    %0 = tpu.iota {dimensions = array<i32: 1>} : vector<1x256xi32>
    %c15_i32 = arith.constant 15 : i32
    %1 = vector.broadcast %c15_i32 : i32 to vector<1x256xi32>
    %2 = arith.andi %0, %1 : vector<1x256xi32>
    %c16_i32 = arith.constant 16 : i32
    %3 = vector.broadcast %c16_i32 : i32 to vector<1x256xi32>
    %4 = arith.cmpi sge, %0, %3 : vector<1x256xi32>
    %c240_i32 = arith.constant 240 : i32
    %5 = vector.broadcast %c240_i32 : i32 to vector<1x256xi32>
    %6 = arith.cmpi slt, %0, %5 : vector<1x256xi32>
    %c0_i32 = arith.constant 0 : i32
    %7 = vector.broadcast %c0_i32 : i32 to vector<1x256xi32>
    %8 = arith.cmpi sgt, %2, %7 : vector<1x256xi32>
    %c15_i32_0 = arith.constant 15 : i32
    %9 = vector.broadcast %c15_i32_0 : i32 to vector<1x256xi32>
    %10 = arith.cmpi slt, %2, %9 : vector<1x256xi32>
    %11 = arith.andi %4, %8 : vector<1x256xi1>
    %12 = arith.extui %11 : vector<1x256xi1> to vector<1x256xi32>
    %13 = arith.sitofp %12 : vector<1x256xi32> to vector<1x256xf32>
    %14 = arith.extui %4 : vector<1x256xi1> to vector<1x256xi32>
    %15 = arith.sitofp %14 : vector<1x256xi32> to vector<1x256xf32>
    %16 = arith.andi %4, %10 : vector<1x256xi1>
    %17 = arith.extui %16 : vector<1x256xi1> to vector<1x256xi32>
    %18 = arith.sitofp %17 : vector<1x256xi32> to vector<1x256xf32>
    %19 = arith.extui %8 : vector<1x256xi1> to vector<1x256xi32>
    %20 = arith.sitofp %19 : vector<1x256xi32> to vector<1x256xf32>
    %21 = arith.extui %10 : vector<1x256xi1> to vector<1x256xi32>
    %22 = arith.sitofp %21 : vector<1x256xi32> to vector<1x256xf32>
    %23 = arith.andi %6, %8 : vector<1x256xi1>
    %24 = arith.extui %23 : vector<1x256xi1> to vector<1x256xi32>
    %25 = arith.sitofp %24 : vector<1x256xi32> to vector<1x256xf32>
    %26 = arith.extui %6 : vector<1x256xi1> to vector<1x256xi32>
    %27 = arith.sitofp %26 : vector<1x256xi32> to vector<1x256xf32>
    %28 = arith.andi %6, %10 : vector<1x256xi1>
    %29 = arith.extui %28 : vector<1x256xi1> to vector<1x256xi32>
    %30 = arith.sitofp %29 : vector<1x256xi32> to vector<1x256xf32>
    %c0 = arith.constant 0 : index
    %c0_1 = arith.constant 0 : index
    %c0_2 = arith.constant 0 : index
    %31 = vector.load %arg1[%c0, %c0_1, %c0_2] : memref<1x16x256xf32, #tpu.memory_space<vmem>>, vector<1x16x256xf32>
    %32 = vector.shape_cast %31 : vector<1x16x256xf32> to vector<16x256xf32>
    %33 = arith.truncf %32 : vector<16x256xf32> to vector<16x256xbf16>
    %c0_3 = arith.constant 0 : index
    %c0_4 = arith.constant 0 : index
    %34 = vector.load %arg2[%c0_3, %c0_4] : memref<32x16xbf16, #tpu.memory_space<vmem>>, vector<32x16xbf16>
    %cst = arith.constant dense<0.000000e+00> : vector<32x256xf32>
    %35 = tpu.matmul %34, %33, %cst {dimension_numbers = #tpu.dot_dimension_numbers<[1], [0], [0], [1], [0, 0, 1, 1], [], []>} : vector<32x16xbf16>, vector<16x256xbf16>, vector<32x256xf32> -> vector<32x256xf32>
    %c0_5 = arith.constant 0 : index
    %c0_6 = arith.constant 0 : index
    %36 = vector.load %arg3[%c0_5, %c0_6] : memref<32x1xf32, #tpu.memory_space<vmem>>, vector<32x1xf32>
    %37 = vector.broadcast %36 : vector<32x1xf32> to vector<32x256xf32>
    %38 = arith.addf %35, %37 : vector<32x256xf32>
    %cst_7 = arith.constant 0.000000e+00 : f32
    %39 = vector.broadcast %cst_7 : f32 to vector<32x256xf32>
    %40 = arith.subf %39, %38 : vector<32x256xf32>
    %41 = math.exp %40 : vector<32x256xf32>
    %cst_8 = arith.constant 1.000000e+00 : f32
    %42 = vector.broadcast %cst_8 : f32 to vector<32x256xf32>
    %43 = arith.addf %42, %41 : vector<32x256xf32>
    %44 = tpu.reciprocal %43 {approx = true} : vector<32x256xf32> -> vector<32x256xf32>
    %45 = arith.mulf %38, %44 : vector<32x256xf32>
    %46 = arith.truncf %45 : vector<32x256xf32> to vector<32x256xbf16>
    %c17_i32 = arith.constant 17 : i32
    %47 = tpu.dynamic_rotate %45 by %c17_i32 dim 1 : vector<32x256xf32>, i32 -> vector<32x256xf32>
    %48 = vector.broadcast %13 : vector<1x256xf32> to vector<32x256xf32>
    %49 = arith.mulf %47, %48 : vector<32x256xf32>
    %50 = arith.truncf %49 : vector<32x256xf32> to vector<32x256xbf16>
    %c0_9 = arith.constant 0 : index
    %c0_10 = arith.constant 0 : index
    %51 = vector.load %arg7[%c0_9, %c0_10] : memref<288x256xbf16, #tpu.memory_space<vmem>>, vector<32x256xbf16>
    tpu.vector_store %arg7[%c0_9, %c0_10], %50 {strides = array<i32>} : memref<288x256xbf16, #tpu.memory_space<vmem>>, vector<32x256xbf16>,
    %c16_i32_11 = arith.constant 16 : i32
    %52 = tpu.dynamic_rotate %45 by %c16_i32_11 dim 1 : vector<32x256xf32>, i32 -> vector<32x256xf32>
    %53 = vector.broadcast %15 : vector<1x256xf32> to vector<32x256xf32>
    %54 = arith.mulf %52, %53 : vector<32x256xf32>
    %55 = arith.truncf %54 : vector<32x256xf32> to vector<32x256xbf16>
    %c32 = arith.constant 32 : index
    %c0_12 = arith.constant 0 : index
    %56 = vector.load %arg7[%c32, %c0_12] : memref<288x256xbf16, #tpu.memory_space<vmem>>, vector<32x256xbf16>
    tpu.vector_store %arg7[%c32, %c0_12], %55 {strides = array<i32>} : memref<288x256xbf16, #tpu.memory_space<vmem>>, vector<32x256xbf16>,
    %c15_i32_13 = arith.constant 15 : i32
    %57 = tpu.dynamic_rotate %45 by %c15_i32_13 dim 1 : vector<32x256xf32>, i32 -> vector<32x256xf32>
    %58 = vector.broadcast %18 : vector<1x256xf32> to vector<32x256xf32>
    %59 = arith.mulf %57, %58 : vector<32x256xf32>
    %60 = arith.truncf %59 : vector<32x256xf32> to vector<32x256xbf16>
    %c64 = arith.constant 64 : index
    %c0_14 = arith.constant 0 : index
    %61 = vector.load %arg7[%c64, %c0_14] : memref<288x256xbf16, #tpu.memory_space<vmem>>, vector<32x256xbf16>
    tpu.vector_store %arg7[%c64, %c0_14], %60 {strides = array<i32>} : memref<288x256xbf16, #tpu.memory_space<vmem>>, vector<32x256xbf16>,
    %c1_i32 = arith.constant 1 : i32
    %62 = tpu.dynamic_rotate %45 by %c1_i32 dim 1 : vector<32x256xf32>, i32 -> vector<32x256xf32>
    %63 = vector.broadcast %20 : vector<1x256xf32> to vector<32x256xf32>
    %64 = arith.mulf %62, %63 : vector<32x256xf32>
    %65 = arith.truncf %64 : vector<32x256xf32> to vector<32x256xbf16>
    %c96 = arith.constant 96 : index
    %c0_15 = arith.constant 0 : index
    %66 = vector.load %arg7[%c96, %c0_15] : memref<288x256xbf16, #tpu.memory_space<vmem>>, vector<32x256xbf16>
    tpu.vector_store %arg7[%c96, %c0_15], %65 {strides = array<i32>} : memref<288x256xbf16, #tpu.memory_space<vmem>>, vector<32x256xbf16>,
    %c128 = arith.constant 128 : index
    %c0_16 = arith.constant 0 : index
    %67 = vector.load %arg7[%c128, %c0_16] : memref<288x256xbf16, #tpu.memory_space<vmem>>, vector<32x256xbf16>
    tpu.vector_store %arg7[%c128, %c0_16], %46 {strides = array<i32>} : memref<288x256xbf16, #tpu.memory_space<vmem>>, vector<32x256xbf16>,
    %c255_i32 = arith.constant 255 : i32
    %68 = tpu.dynamic_rotate %45 by %c255_i32 dim 1 : vector<32x256xf32>, i32 -> vector<32x256xf32>
    %69 = vector.broadcast %22 : vector<1x256xf32> to vector<32x256xf32>
    %70 = arith.mulf %68, %69 : vector<32x256xf32>
    %71 = arith.truncf %70 : vector<32x256xf32> to vector<32x256xbf16>
    %c160 = arith.constant 160 : index
    %c0_17 = arith.constant 0 : index
    %72 = vector.load %arg7[%c160, %c0_17] : memref<288x256xbf16, #tpu.memory_space<vmem>>, vector<32x256xbf16>
    tpu.vector_store %arg7[%c160, %c0_17], %71 {strides = array<i32>} : memref<288x256xbf16, #tpu.memory_space<vmem>>, vector<32x256xbf16>,
    %c241_i32 = arith.constant 241 : i32
    %73 = tpu.dynamic_rotate %45 by %c241_i32 dim 1 : vector<32x256xf32>, i32 -> vector<32x256xf32>
    %74 = vector.broadcast %25 : vector<1x256xf32> to vector<32x256xf32>
    %75 = arith.mulf %73, %74 : vector<32x256xf32>
    %76 = arith.truncf %75 : vector<32x256xf32> to vector<32x256xbf16>
    %c192 = arith.constant 192 : index
    %c0_18 = arith.constant 0 : index
    %77 = vector.load %arg7[%c192, %c0_18] : memref<288x256xbf16, #tpu.memory_space<vmem>>, vector<32x256xbf16>
    tpu.vector_store %arg7[%c192, %c0_18], %76 {strides = array<i32>} : memref<288x256xbf16, #tpu.memory_space<vmem>>, vector<32x256xbf16>,
    %c240_i32_19 = arith.constant 240 : i32
    %78 = tpu.dynamic_rotate %45 by %c240_i32_19 dim 1 : vector<32x256xf32>, i32 -> vector<32x256xf32>
    %79 = vector.broadcast %27 : vector<1x256xf32> to vector<32x256xf32>
    %80 = arith.mulf %78, %79 : vector<32x256xf32>
    %81 = arith.truncf %80 : vector<32x256xf32> to vector<32x256xbf16>
    %c224 = arith.constant 224 : index
    %c0_20 = arith.constant 0 : index
    %82 = vector.load %arg7[%c224, %c0_20] : memref<288x256xbf16, #tpu.memory_space<vmem>>, vector<32x256xbf16>
    tpu.vector_store %arg7[%c224, %c0_20], %81 {strides = array<i32>} : memref<288x256xbf16, #tpu.memory_space<vmem>>, vector<32x256xbf16>,
    %c239_i32 = arith.constant 239 : i32
    %83 = tpu.dynamic_rotate %45 by %c239_i32 dim 1 : vector<32x256xf32>, i32 -> vector<32x256xf32>
    %84 = vector.broadcast %30 : vector<1x256xf32> to vector<32x256xf32>
    %85 = arith.mulf %83, %84 : vector<32x256xf32>
    %86 = arith.truncf %85 : vector<32x256xf32> to vector<32x256xbf16>
    %c256 = arith.constant 256 : index
    %c0_21 = arith.constant 0 : index
    %87 = vector.load %arg7[%c256, %c0_21] : memref<288x256xbf16, #tpu.memory_space<vmem>>, vector<32x256xbf16>
    tpu.vector_store %arg7[%c256, %c0_21], %86 {strides = array<i32>} : memref<288x256xbf16, #tpu.memory_space<vmem>>, vector<32x256xbf16>,
    %c0_22 = arith.constant 0 : index
    %c0_23 = arith.constant 0 : index
    %c0_24 = arith.constant 0 : index
    %88 = vector.load %arg4[%c0_22, %c0_23, %c0_24] : memref<1x32x288xbf16, #tpu.memory_space<vmem>>, vector<1x32x288xbf16>
    %89 = vector.shape_cast %88 : vector<1x32x288xbf16> to vector<32x288xbf16>
    %c0_25 = arith.constant 0 : index
    %c0_26 = arith.constant 0 : index
    %90 = vector.load %arg7[%c0_25, %c0_26] : memref<288x256xbf16, #tpu.memory_space<vmem>>, vector<288x256xbf16>
    %cst_27 = arith.constant dense<0.000000e+00> : vector<32x256xf32>
    %91 = tpu.matmul %89, %90, %cst_27 {dimension_numbers = #tpu.dot_dimension_numbers<[1], [0], [0], [1], [0, 0, 1, 1], [], []>} : vector<32x288xbf16>, vector<288x256xbf16>, vector<32x256xf32> -> vector<32x256xf32>
    %c0_28 = arith.constant 0 : index
    %c0_29 = arith.constant 0 : index
    %c0_30 = arith.constant 0 : index
    %92 = vector.load %arg5[%c0_28, %c0_29, %c0_30] : memref<1x32x1xf32, #tpu.memory_space<vmem>>, vector<1x32x1xf32>
    %93 = vector.shape_cast %92 : vector<1x32x1xf32> to vector<32x1xf32>
    %94 = vector.broadcast %93 : vector<32x1xf32> to vector<32x256xf32>
    %95 = arith.addf %91, %94 : vector<32x256xf32>
    %cst_31 = arith.constant 0.000000e+00 : f32
    %96 = vector.broadcast %cst_31 : f32 to vector<32x256xf32>
    %97 = arith.subf %96, %95 : vector<32x256xf32>
    %98 = math.exp %97 : vector<32x256xf32>
    %cst_32 = arith.constant 1.000000e+00 : f32
    %99 = vector.broadcast %cst_32 : f32 to vector<32x256xf32>
    %100 = arith.addf %99, %98 : vector<32x256xf32>
    %101 = tpu.reciprocal %100 {approx = true} : vector<32x256xf32> -> vector<32x256xf32>
    %102 = arith.mulf %95, %101 : vector<32x256xf32>
    %103 = arith.addf %102, %45 : vector<32x256xf32>
    %c0_33 = arith.constant 0 : index
    %c0_34 = arith.constant 0 : index
    %c0_35 = arith.constant 0 : index
    %104 = vector.load %arg6[%c0_33, %c0_34, %c0_35] : memref<1x32x256xf32, #tpu.memory_space<vmem>>, vector<1x32x256xf32>
    %105 = vector.shape_cast %104 : vector<1x32x256xf32> to vector<32x256xf32>
    %106 = vector.shape_cast %103 : vector<32x256xf32> to vector<1x32x256xf32>
    tpu.vector_store %arg6[%c0_33, %c0_34, %c0_35], %106 {strides = array<i32>} : memref<1x32x256xf32, #tpu.memory_space<vmem>>, vector<1x32x256xf32>,
    return
  }
  func.func @transform_0(%arg0: i32) -> (i32, i32, i32) {
    %c0_i32 = arith.constant 0 : i32
    %c0_i32_0 = arith.constant 0 : i32
    %c0_i32_1 = arith.constant 0 : i32
    return %arg0, %c0_i32, %c0_i32_0 : i32, i32, i32
  }
  func.func @transform_1(%arg0: i32) -> (i32, i32) {
    %c0_i32 = arith.constant 0 : i32
    %c0_i32_0 = arith.constant 0 : i32
    %c0_i32_1 = arith.constant 0 : i32
    return %c0_i32, %c0_i32_0 : i32, i32
  }
  func.func @transform_2(%arg0: i32) -> (i32, i32) {
    %c0_i32 = arith.constant 0 : i32
    %c0_i32_0 = arith.constant 0 : i32
    %c0_i32_1 = arith.constant 0 : i32
    return %c0_i32, %c0_i32_0 : i32, i32
  }
  func.func @transform_3(%arg0: i32) -> (i32, i32, i32) {
    %c0_i32 = arith.constant 0 : i32
    %c0_i32_0 = arith.constant 0 : i32
    %c0_i32_1 = arith.constant 0 : i32
    %c0_i32_2 = arith.constant 0 : i32
    return %c0_i32, %c0_i32_0, %c0_i32_1 : i32, i32, i32
  }
  func.func @transform_4(%arg0: i32) -> (i32, i32, i32) {
    %c0_i32 = arith.constant 0 : i32
    %c0_i32_0 = arith.constant 0 : i32
    %c0_i32_1 = arith.constant 0 : i32
    %c0_i32_2 = arith.constant 0 : i32
    return %c0_i32, %c0_i32_0, %c0_i32_1 : i32, i32, i32
  }
  func.func @transform_5(%arg0: i32) -> (i32, i32, i32) {
    %c0_i32 = arith.constant 0 : i32
    %c0_i32_0 = arith.constant 0 : i32
    %c0_i32_1 = arith.constant 0 : i32
    return %arg0, %c0_i32, %c0_i32_0 : i32, i32, i32
  }
}

</mosaic_0001>

<bundles_post_ra>
// kernel: c1_forward.1
= control target key start
LH: loop header
LB: loop body
LE: loop exit
PB: predicated region body
PF: predicated region fallthrough
CT: control target
= control target key end

     0   :  { %s1294_s18 = smov 0   ;;  %s1986_s0 = inlined_call_operand.vmem [shape: f32[2,16,256], index: 0, kind: input, shape index: {}]   ;;  %s1987_s1 = inlined_call_operand.vmem [shape: bf16[32,16], index: 1, kind: input, shape index: {}]   ;;  %s1988_s2 = inlined_call_operand.vmem [shape: f32[32,1], index: 2, kind: input, shape index: {}]   ;;  %s1989_s3 = inlined_call_operand.vmem [shape: bf16[1,32,288], index: 3, kind: input, shape index: {}]   ;;  %s1990_s4 = inlined_call_operand.vmem [shape: f32[1,32,1], index: 4, kind: input, shape index: {}]   ;;  %s1991_s5 = inlined_call_operand.vmem [shape: f32[2,32,256], index: 5, kind: output, shape index: {}]  }
   0x1 LB: > { %s1097_s19 = sadd.s32 4294967295, %s1252_s18   ;;  %p1101_p0 = scmp.ge.s32.totalorder %s1252_s18, 1  ;;  %s1252_s18 = sphi %s1294_s18, %s15_s18  }
   0x2   : > { %p187_p1 = scmp.lt.s32.totalorder %s1252_s18, 3 }
   0x4   : > { %p188_p2 = pnand %p1101_p0, %p187_p1 }
   0x5   : > { %p215_p3 = scmp.lt.s32.totalorder (!%p188_p2), %s1097_s19, 1  ;;  %v1992_v0 = vmov (!%p188_p2), 0   ;;  %v289_v1 = vld [vmem:[%s1988_s2] sm:$0xff] (!%p188_p2)  ;;  %v290_v2 = vld [vmem:[%s1988_s2 + $0x8] sm:$0xff] (!%p188_p2)  ;;  %v291_v3 = vld [vmem:[%s1988_s2 + $0x10] sm:$0xff] (!%p188_p2)  ;;  %vm323_vm0 = vcmask (!%p188_p2), 130048  }
   0x6   : > { %191 = sbr.rel (%p188_p2) target bundleno = 775 (0x307), region = 40  ;;  %362 = vmatprep.mubr.bf16.mxu0 (!%p188_p2), %v1992_v0  ;;  %1170 = vset.pattern.permute.xlu0 (!%p188_p2), %v1992_v0  ;;  %v292_v4 = vld [vmem:[%s1988_s2 + $0x18] sm:$0xff] (!%p188_p2)  ;;  %v1172_v11 = vld [vmem:[%s1987_s1] sm:$0xff] (!%p188_p2)   ;;  %v1173_v12 = vld [vmem:[%s1987_s1 + $0x8] sm:$0xff] (!%p188_p2)   ;;  %s1255_s11 = smov (!%p188_p2), 17  }
   0x7   : > { %1171 = vset.pattern.permute.xlu1 (!%p188_p2), %v1992_v0  ;;  %295 = vperm.xlu0 (!%p188_p2), %1170, %v289_v1   ;;  %s1256_s12 = smov (!%p188_p2), 16   ;;  %s1257_s13 = smov (!%p188_p2), 15  }
   0x8   : > { %305 = vperm.xlu1 (!%p188_p2), %1171, %v291_v3   ;;  %s1258_s14 = smov (!%p188_p2), 1   ;;  %s1259_s15 = smov (!%p188_p2), 127  }
   0x9   : > { %s1260_s16 = smov (!%p188_p2), 113   ;;  %s1261_s17 = smov (!%p188_p2), 112  }
   0xa   : > { %s1262_s20 = smov (!%p188_p2), 111  }
   0xb   : > { %300 = vperm.xlu0 (!%p188_p2), %1170, %v290_v2  }
   0xc   : > { %310 = vperm.xlu1 (!%p188_p2), %1171, %v292_v4  }
   0xd   : > { %s2011_s19 = smov (!%p215_p3, %s1097_s19), 1 }
   0xe   : > { %s1134_s28 = sshll.u32 %s2011_s19, 5 }
   0xf   : > { %s219_s6 = scalar_lea.vmem %s1986_s0, %s1134_s28 }
  0x10   : > { %v280_v5 = vld [vmem:[%s219_s6 + $0x8] sm:$0xff]  ;;  %v282_v6 = vld [vmem:[%s219_s6 + $0x18] sm:$0xff]  ;;  %v279_v7 = vld [vmem:[%s219_s6] sm:$0xff] }
  0x11   : > { %v284_v8 = vpack.c.bf16 %v282_v6, %v280_v5  ;;  %v281_v9 = vld [vmem:[%s219_s6 + $0x10] sm:$0xff]  ;;  %v226_v6 = vlaneseq }
  0x12   : > { %v283_v10 = vpack.c.bf16 %v281_v9, %v279_v7 }
  0x13   : > { %330 = vmatprep.subr.bf16.mxu0 %v284_v8  ;;  %v1387_v9 = vand.u32 127, %v226_v6 }
  0x14   : > { %331 = vmatpush1.bf16.msra.mxu0 %v283_v10 }
  0x15   : > { %vm231_vm4 = vcmp.ge.s32.totalorder %v1387_v9, 16  ;;  %vm451_vm7 = vcmp.lt.s32.totalorder %v1387_v9, 17  ;;  %vm492_vm8 = vcmp.lt.s32.totalorder %v1387_v9, 16  ;;  %vm533_vm12 = vcmp.lt.s32.totalorder %v1387_v9, 15 }
  0x16   : > { %vm574_vm13 = vcmp.lt.s32.totalorder %v1387_v9, 1  ;;  %vm619_vm14 = vcmp.lt.s32.totalorder %v1387_v9, 127  ;;  %vm660_vm15 = vcmp.lt.s32.totalorder %v1387_v9, 113 }
  0x17   : > { %1122 = vmatmul.mubr.msk.bf16.vlgmr.msra.gmra.mrb[0].mxu0 %vm323_vm0, %v1172_v11 }
  0x18   : > { %372 = vmatprep.mubr.bf16.mxu0 %v1992_v0 }
  0x1f   : > { %1123 = vmatmul.mubr.msk.bf16.gmra.mrb[4].mxu0 %vm323_vm0, %v1173_v12 }
  0x20   : > { %957 = vmatprep.mubr.bf16.mxu0 %v1992_v0 }
  0x86   : > { %v296_v13 = vpop.permute.xlu0 %295 }
  0x87   : > { %v306_v39 = vpop.permute.xlu1 %305 }
  0x8a   : > { %v301_v17 = vpop.permute.xlu0 %300 }
  0x8b   : > { %v311_v43 = vpop.permute.xlu1 %310 }
  0xea   : > { %v364_v14 = vpop.f32.mrb[0].mxu0 }
  0xeb   : > { %v365_v15 = vadd.f32 %v364_v14, %v296_v13  ;;  %v366_v16 = vpop.f32.mrb[1].mxu0 }
  0xec   : > { %v368_v18 = vpop.f32.mrb[2].mxu0  ;;  %v367_v29 = vadd.f32 %v366_v16, %v296_v13 }
  0xed   : > { %v383_v19 = vsub.f32 0.0, %v365_v15  ;;  %v369_v20 = vadd.f32 %v368_v18, %v301_v17  ;;  %v370_v21 = vpop.f32.mrb[3].mxu0 }
  0xee   : > { %v371_v30 = vadd.f32 %v370_v21, %v301_v17  ;;  %v384_v32 = vsub.f32 0.0, %v367_v29 }
  0xef   : > { %v391_v22 = vmul.f32 1.442695, %v383_v19  ;;  %v385_v23 = vsub.f32 0.0, %v369_v20 }
  0xf0   : > { %v386_v35 = vsub.f32 0.0, %v371_v30  ;;  %v393_v37 = vmul.f32 1.442695, %v384_v32 }
  0xf1   : > { %1182 = vpow2.f32 %v391_v22  ;;  %v395_v24 = vmul.f32 1.442695, %v385_v23 }
  0xf2   : > { %v374_v25 = vpop.f32.mrb[4].mxu0  ;;  %v397_v38 = vmul.f32 1.442695, %v386_v35  ;;  %v813_v35 = vld [vmem:[%s1990_s4 + $0x10] sm:$0xff] }
  0xf3   : > { %1184 = vpow2.f32 %v395_v24  ;;  %v376_v26 = vpop.f32.mrb[5].mxu0  ;;  %v1335_v45 = vadd.f32 %v374_v25, %v306_v39  ;;  %v1176_v25 = vld [vmem:[%s1989_s3 + $0x4] ss:$12 sps:$4 sm:$0xff]  }
  0xf4   : > { %v378_v27 = vpop.f32.mrb[6].mxu0  ;;  %v377_v56 = vadd.f32 %v376_v26, %v306_v39  ;;  %904 = vmatprep.mubr.bf16.mxu1 %v1176_v25 }
  0xf5   : > { %v380_v28 = vpop.f32.mrb[7].mxu0  ;;  %v1339_v47 = vadd.f32 %v378_v27, %v311_v43  ;;  %v387_v49 = vsub.f32 0.0, %v1335_v45 }
  0xf6   : > { %v381_v60 = vadd.f32 %v380_v28, %v311_v43  ;;  %v388_v63 = vsub.f32 0.0, %v377_v56 }
  0xf7   : > { %v389_v51 = vsub.f32 0.0, %v1339_v47  ;;  %v399_v53 = vmul.f32 1.442695, %v387_v49 }
  0xf8   : > { %v390_v2 = vsub.f32 0.0, %v381_v60  ;;  %v401_v4 = vmul.f32 1.442695, %v388_v63 }
  0xf9   : > { %v403_v54 = vmul.f32 1.442695, %v389_v51 }
  0xfa   : > { %v405_v5 = vmul.f32 1.442695, %v390_v2 }
  0xfb   : > { %v1183_v31 = vpop.eup %1182 }
  0xfc   : > { %v407_v33 = vadd.f32 1.0, %v1183_v31  ;;  %v811_v31 = vld [vmem:[%s1990_s4] sm:$0xff] }
  0xfd   : > { %v1185_v34 = vpop.eup %1184 }
  0xfe   : > { %1186 = vrcp.f32 %v407_v33  ;;  %v409_v36 = vadd.f32 1.0, %v1185_v34  ;;  %v812_v33 = vld [vmem:[%s1990_s4 + $0x8] sm:$0xff] }
 0x100   : > { %1188 = vrcp.f32 %v409_v36  ;;  %v229_v36 = vand.u32 15, %v1387_v9 }
 0x101   : > { %1190 = vpow2.f32 %v393_v37 }
 0x102   : > { %1192 = vpow2.f32 %v397_v38  ;;  %v814_v38 = vld [vmem:[%s1990_s4 + $0x18] sm:$0xff]  ;;  %vm1515_vm5 = vcmp.gt.s32.totalorder %v229_v36, 0  ;;  %vm1545_vm9 = vcmp.lt.s32.totalorder %v229_v36, 15 }
 0x103   : > { %vm239_vm6 = vmand %vm231_vm4, %vm1515_vm5 }
 0x104   : > { %vm249_vm11 = vmand %vm231_vm4, %vm1545_vm9 }
 0x108   : > { %v1187_v40 = vpop.eup %1186 }
 0x109   : > { %v1331_v41 = vmul.f32 %v1187_v40, %v365_v15  ;;  %v1400_v15 = vadd.s32 128, %v1387_v9 }
 0x10a   : > { %v1189_v42 = vpop.eup %1188 }
 0x10b   : > { %v1333_v44 = vmul.f32 %v1189_v42, %v369_v20  ;;  %435 = vrot.lane.b32.xlu0 %v1331_v41, %s1255_s11  ;;  %v1191_v46 = vpop.eup %1190  ;;  %v230_v17 = vand.u32 15, %v1400_v15  ;;  %vm234_vm2 = vcmp.lt.s32.totalorder %v1400_v15, 240 }
 0x10c   : > { %v1193_v48 = vpop.eup %1192  ;;  %v408_v50 = vadd.f32 1.0, %v1191_v46  ;;  %v1993_v46 = vmov 0.0  }
 0x10d   : > { %437 = vrot.lane.b32.xlu1 %v1333_v44, %s1255_s11  ;;  %v410_v52 = vadd.f32 1.0, %v1193_v48  ;;  %vm1413_vm1 = vcmp.gt.s32.totalorder %v230_v17, 0  ;;  %vm1562_vm10 = vcmp.lt.s32.totalorder %v230_v17, 15 }
 0x10e   : > { %1194 = vrcp.f32 %v408_v50  ;;  %vm1424_vm3 = vmand %vm234_vm2, %vm1413_vm1  ;;  %v1538_v50 = vsel %vm1413_vm1, 1.0, %v1993_v46  ;;  %v1595_v17 = vsel %vm1562_vm10, 1.0, %v1993_v46  ;;  %vm742_vm1 = vcmp.lt.s32.totalorder %v1387_v9, 111 }
 0x10f   : > { %476 = vrot.lane.b32.xlu0 %v1331_v41, %s1256_s12  ;;  %1196 = vrcp.f32 %v410_v52  ;;  %vm274_vm0 = vmand %vm234_vm2, %vm1562_vm10 }
 0x110   : > { %1198 = vpow2.f32 %v399_v53 }
 0x111   : > { %478 = vrot.lane.b32.xlu1 %v1333_v44, %s1256_s12  ;;  %1200 = vpow2.f32 %v403_v54 }
 0x113   : > { %517 = vrot.lane.b32.xlu0 %v1331_v41, %s1257_s13 }
 0x115   : > { %519 = vrot.lane.b32.xlu1 %v1333_v44, %s1257_s13 }
 0x117   : > { %558 = vrot.lane.b32.xlu0 %v1331_v41, %s1258_s14 }
 0x118   : > { %v1195_v55 = vpop.eup %1194 }
 0x119   : > { %560 = vrot.lane.b32.xlu1 %v1333_v44, %s1258_s14  ;;  %v1197_v57 = vpop.eup %1196  ;;  %v1363_v59 = vmul.f32 %v1195_v55, %v367_v29 }
 0x11a   : > { %v1199_v58 = vpop.eup %1198  ;;  %v1367_v62 = vmul.f32 %v1197_v57, %v371_v30 }
 0x11b   : > { %603 = vrot.lane.b32.xlu0 %v1331_v41, %s1259_s15  ;;  %v1201_v61 = vpop.eup %1200  ;;  %v411_v1 = vadd.f32 1.0, %v1199_v58 }
 0x11c   : > { %v413_v3 = vadd.f32 1.0, %v1201_v61  ;;  %v1556_v61 = vsel %vm231_vm4, 1.0, %v1993_v46 }
 0x11d   : > { %605 = vrot.lane.b32.xlu1 %v1333_v44, %s1259_s15  ;;  %1202 = vrcp.f32 %v411_v1 }
 0x11e   : > { %1204 = vrcp.f32 %v413_v3 }
 0x11f   : > { %644 = vrot.lane.b32.xlu0 %v1331_v41, %s1260_s16  ;;  %1206 = vpow2.f32 %v401_v4 }
 0x120   : > { %1208 = vpow2.f32 %v405_v5 }
 0x121   : > { %646 = vrot.lane.b32.xlu1 %v1333_v44, %s1260_s16 }
 0x123   : > { %443 = vrot.lane.b32.xlu0 %v1363_v59, %s1255_s11 }
 0x125   : > { %445 = vrot.lane.b32.xlu1 %v1367_v62, %s1255_s11 }
 0x127   : > { %484 = vrot.lane.b32.xlu0 %v1363_v59, %s1256_s12  ;;  %v1203_v7 = vpop.eup %1202 }
 0x128   : > { %v1205_v8 = vpop.eup %1204  ;;  %v1390_v11 = vmul.f32 %v1203_v7, %v1335_v45 }
 0x129   : > { %486 = vrot.lane.b32.xlu1 %v1367_v62, %s1256_s12  ;;  %v1207_v10 = vpop.eup %1206  ;;  %v1395_v13 = vmul.f32 %v1205_v8, %v1339_v47  ;;  %v1529_v47 = vsel %vm239_vm6, 1.0, %v1993_v46 }
 0x12a   : > { %v1209_v12 = vpop.eup %1208  ;;  %v412_v14 = vadd.f32 1.0, %v1207_v10 }
 0x12b   : > { %525 = vrot.lane.b32.xlu0 %v1363_v59, %s1257_s13  ;;  %v414_v16 = vadd.f32 1.0, %v1209_v12 }
 0x12c   : > { %1210 = vrcp.f32 %v412_v14 }
 0x12d   : > { %527 = vrot.lane.b32.xlu1 %v1367_v62, %s1257_s13  ;;  %1212 = vrcp.f32 %v414_v16  ;;  %v1590_v16 = vsel %vm249_vm11, 1.0, %v1993_v46 }
 0x12f   : > { %566 = vrot.lane.b32.xlu0 %v1363_v59, %s1258_s14 }
 0x131   : > { %568 = vrot.lane.b32.xlu1 %v1367_v62, %s1258_s14 }
 0x133   : > { %611 = vrot.lane.b32.xlu0 %v1363_v59, %s1259_s15 }
 0x135   : > { %613 = vrot.lane.b32.xlu1 %v1367_v62, %s1259_s15 }
 0x136   : > { %v1211_v20 = vpop.eup %1210 }
 0x137   : > { %439 = vrot.lane.b32.xlu0 %v1390_v11, %s1255_s11  ;;  %v1213_v21 = vpop.eup %1212  ;;  %v1434_v22 = vmul.f32 %v1211_v20, %v377_v56 }
 0x138   : > { %v1438_v23 = vmul.f32 %v1213_v21, %v381_v60 }
 0x139   : > { %441 = vrot.lane.b32.xlu1 %v1395_v13, %s1255_s11 }
 0x13b   : > { %480 = vrot.lane.b32.xlu0 %v1390_v11, %s1256_s12 }
 0x13d   : > { %482 = vrot.lane.b32.xlu1 %v1395_v13, %s1256_s12 }
 0x13f   : > { %521 = vrot.lane.b32.xlu0 %v1390_v11, %s1257_s13 }
 0x141   : > { %523 = vrot.lane.b32.xlu1 %v1395_v13, %s1257_s13 }
 0x143   : > { %562 = vrot.lane.b32.xlu0 %v1390_v11, %s1258_s14 }
 0x145   : > { %564 = vrot.lane.b32.xlu1 %v1395_v13, %s1258_s14 }
 0x147   : > { %607 = vrot.lane.b32.xlu0 %v1390_v11, %s1259_s15 }
 0x149   : > { %609 = vrot.lane.b32.xlu1 %v1395_v13, %s1259_s15 }
 0x14b   : > { %447 = vrot.lane.b32.xlu0 %v1434_v22, %s1255_s11 }
 0x14d   : > { %449 = vrot.lane.b32.xlu1 %v1438_v23, %s1255_s11 }
 0x14f   : > { %652 = vrot.lane.b32.xlu0 %v1363_v59, %s1260_s16 }
 0x151   : > { %654 = vrot.lane.b32.xlu1 %v1367_v62, %s1260_s16 }
 0x153   : > { %488 = vrot.lane.b32.xlu0 %v1434_v22, %s1256_s12 }
 0x155   : > { %490 = vrot.lane.b32.xlu1 %v1438_v23, %s1256_s12 }
 0x157   : > { %529 = vrot.lane.b32.xlu0 %v1434_v22, %s1257_s13 }
 0x159   : > { %650 = vrot.lane.b32.xlu1 %v1395_v13, %s1260_s16 }
 0x15b   : > { %570 = vrot.lane.b32.xlu0 %v1434_v22, %s1258_s14 }
 0x15d   : > { %531 = vrot.lane.b32.xlu1 %v1438_v23, %s1257_s13 }
 0x15f   : > { %615 = vrot.lane.b32.xlu0 %v1434_v22, %s1259_s15 }
 0x161   : > { %687 = vrot.lane.b32.xlu1 %v1333_v44, %s1261_s17 }
 0x163   : > { %648 = vrot.lane.b32.xlu0 %v1390_v11, %s1260_s16 }
 0x165   : > { %572 = vrot.lane.b32.xlu1 %v1438_v23, %s1258_s14 }
 0x167   : > { %656 = vrot.lane.b32.xlu0 %v1434_v22, %s1260_s16 }
 0x169   : > { %695 = vrot.lane.b32.xlu1 %v1367_v62, %s1261_s17 }
 0x16b   : > { %685 = vrot.lane.b32.xlu0 %v1331_v41, %s1261_s17 }
 0x16d   : > { %728 = vrot.lane.b32.xlu1 %v1333_v44, %s1262_s20 }
 0x16f   : > { %693 = vrot.lane.b32.xlu0 %v1363_v59, %s1261_s17 }
 0x171   : > { %736 = vrot.lane.b32.xlu1 %v1367_v62, %s1262_s20 }
 0x173   : > { %726 = vrot.lane.b32.xlu0 %v1331_v41, %s1262_s20 }
 0x175   : > { %617 = vrot.lane.b32.xlu1 %v1438_v23, %s1259_s15 }
 0x177   : > { %734 = vrot.lane.b32.xlu0 %v1363_v59, %s1262_s20 }
 0x179   : > { %691 = vrot.lane.b32.xlu1 %v1395_v13, %s1261_s17 }
 0x17b   : > { %689 = vrot.lane.b32.xlu0 %v1390_v11, %s1261_s17 }
 0x17d   : > { %658 = vrot.lane.b32.xlu1 %v1438_v23, %s1260_s16  ;;  %v436_v24 = vpop.permute.xlu0 %435  ;;  %s1135_s16 = sshll.u32 %s2011_s19, 6 }
 0x17e   : > { %s224_s21 = scalar_lea.vmem %s1991_s5, %s1135_s16 }
 0x17f   : > { %v438_v26 = vpop.permute.xlu1 %437  ;;  %697 = vrot.lane.b32.xlu0 %v1434_v22, %s1261_s17 }
 0x181   : > { %732 = vrot.lane.b32.xlu1 %v1395_v13, %s1262_s20  ;;  %v477_v27 = vpop.permute.xlu0 %476 }
 0x183   : > { %v479_v28 = vpop.permute.xlu1 %478  ;;  %730 = vrot.lane.b32.xlu0 %v1390_v11, %s1262_s20 }
 0x185   : > { %699 = vrot.lane.b32.xlu1 %v1438_v23, %s1261_s17  ;;  %v518_v29 = vpop.permute.xlu0 %517 }
 0x187   : > { %v1489_v30 = vpop.permute.xlu1 %519  ;;  %738 = vrot.lane.b32.xlu0 %v1434_v22, %s1262_s20 }
 0x189   : > { %740 = vrot.lane.b32.xlu1 %v1438_v23, %s1262_s20  ;;  %v1496_v32 = vpop.permute.xlu0 %558 }
 0x18b   : > { %v1501_v34 = vpop.permute.xlu1 %560  ;;  %817 = vperm.xlu0 %1170, %v811_v31  }
 0x18d   : > { %822 = vperm.xlu1 %1171, %v812_v33   ;;  %v1507_v37 = vpop.permute.xlu0 %603 }
 0x18f   : > { %v1512_v39 = vpop.permute.xlu1 %605  ;;  %827 = vperm.xlu0 %1170, %v813_v35   ;;  %v1625_v35 = vsel %vm1515_vm5, 1.0, %v1993_v46 }
 0x191   : > { %832 = vperm.xlu1 %1171, %v814_v38   ;;  %v1519_v42 = vpop.permute.xlu0 %644 }
 0x193   : > { %v1521_v43 = vpop.permute.xlu1 %646 }
 0x195   : > { %v444_v45 = vpop.permute.xlu0 %443 }
 0x196   : > { %v452_v48 = vsel %vm451_vm7, %v436_v24, %v444_v45  ;;  %v456_v49 = vsel %vm451_vm7, %v444_v45, %v436_v24 }
 0x197   : > { %v446_v51 = vpop.permute.xlu1 %445  ;;  %v460_v55 = vmul.f32 %v1529_v47, %v456_v49  ;;  %v461_v58 = vmul.f32 %v1538_v50, %v452_v48 }
 0x198   : > { %v453_v52 = vsel %vm451_vm7, %v438_v26, %v446_v51  ;;  %v457_v53 = vsel %vm451_vm7, %v446_v51, %v438_v26 }
 0x199   : > { %v462_v56 = vmul.f32 %v1529_v47, %v457_v53  ;;  %v485_v57 = vpop.permute.xlu0 %484  ;;  %v463_v60 = vmul.f32 %v1538_v50, %v453_v52 }
 0x19a   : > { %v497_v63 = vsel %vm492_vm8, %v485_v57, %v477_v27  ;;  %v1573_v5 = vsel %vm492_vm8, %v477_v27, %v485_v57 }
 0x19b   : > { %v487_v1 = vpop.permute.xlu1 %486  ;;  %v469_v2 = vpack.c.bf16 %v463_v60, %v461_v58  ;;  %v468_v4 = vpack.c.bf16 %v462_v56, %v460_v55  ;;  %v1582_v8 = vmul.f32 %v1556_v61, %v497_v63  ;;  %v1659_v56 = vsel %vm1545_vm9, 1.0, %v1993_v46 }
 0x19c   : > { %v1577_v6 = vsel %vm492_vm8, %v479_v28, %v487_v1  ;;  %v498_v7 = vsel %vm492_vm8, %v487_v1, %v479_v28 }
 0x19d   : > { %v1585_v10 = vmul.f32 %v1556_v61, %v498_v7  ;;  %v510_v12 = vpack.c.bf16 %v1577_v6, %v1573_v5  ;;  %872 = vmatprep.subr.bf16.mxu1 %v469_v2  ;;  %v526_v14 = vpop.permute.xlu0 %525 }
 0x19e   : > { %v534_v18 = vsel %vm533_vm12, %v518_v29, %v526_v14  ;;  %v538_v20 = vsel %vm533_vm12, %v526_v14, %v518_v29  ;;  %873 = vmatpush1.bf16.msra.mxu1 %v468_v4 }
 0x19f   : > { %v528_v21 = vpop.permute.xlu1 %527  ;;  %v509_v24 = vpack.c.bf16 %v1585_v10, %v1582_v8  ;;  %v1611_v27 = vmul.f32 %v1590_v16, %v538_v20  ;;  %v1614_v28 = vmul.f32 %v1595_v17, %v534_v18 }
 0x1a0   : > { %v535_v25 = vsel %vm533_vm12, %v1489_v30, %v528_v21  ;;  %v539_v26 = vsel %vm533_vm12, %v528_v21, %v1489_v30 }
 0x1a1   : > { %v1617_v29 = vmul.f32 %v1590_v16, %v539_v26  ;;  %v1620_v31 = vmul.f32 %v1595_v17, %v535_v25  ;;  %v567_v33 = vpop.permute.xlu0 %566 }
 0x1a2   : > { %v575_v30 = vsel %vm574_vm13, %v1496_v32, %v567_v33  ;;  %v579_v36 = vsel %vm574_vm13, %v567_v33, %v1496_v32 }
 0x1a3   : > { %v569_v38 = vpop.permute.xlu1 %568  ;;  %v551_v45 = vpack.c.bf16 %v1620_v31, %v1614_v28  ;;  %v550_v48 = vpack.c.bf16 %v1617_v29, %v1611_v27  ;;  %v1645_v51 = vmul.f32 %v1625_v35, %v579_v36  ;;  %v1648_v32 = vmul.f32 %v1538_v50, %v575_v30 }
 0x1a4   : > { %v576_v40 = vsel %vm574_vm13, %v1501_v34, %v569_v38  ;;  %v580_v49 = vsel %vm574_vm13, %v569_v38, %v1501_v34 }
 0x1a5   : > { %v1651_v52 = vmul.f32 %v1625_v35, %v580_v49  ;;  %v1654_v53 = vmul.f32 %v1538_v50, %v576_v40  ;;  %v612_v55 = vpop.permute.xlu0 %611 }
 0x1a6   : > { %v620_v34 = vsel %vm619_vm14, %v1507_v37, %v612_v55  ;;  %v624_v57 = vsel %vm619_vm14, %v612_v55, %v1507_v37 }
 0x1a7   : > { %v614_v58 = vpop.permute.xlu1 %613  ;;  %v592_v60 = vpack.c.bf16 %v1654_v53, %v1648_v32  ;;  %v1678_v2 = vmul.f32 %v1659_v56, %v620_v34  ;;  %v1681_v37 = vmul.f32 %v1595_v17, %v624_v57  ;;  %v2005_v32 = vpack.c.bf16 %v1651_v52, %v1645_v51 }
 0x1a8   : > { %v621_v54 = vsel %vm619_vm14, %v1512_v39, %v614_v58  ;;  %v625_v1 = vsel %vm619_vm14, %v614_v58, %v1512_v39  ;;  %v434_v51 = vpack.c.bf16 %v1438_v23, %v1434_v22 }
 0x1a9   : > { %v1684_v4 = vmul.f32 %v1659_v56, %v621_v54  ;;  %v1687_v7 = vmul.f32 %v1595_v17, %v625_v1  ;;  %v440_v14 = vpop.permute.xlu0 %439  ;;  %v1713_v1 = vsel %vm1424_vm3, 1.0, %v1993_v46  ;;  %vm701_vm3 = vcmp.lt.s32.totalorder %v1387_v9, 112 }
 0x1ab   : > { %v442_v18 = vpop.permute.xlu1 %441 }
 0x1ad   : > { %v481_v21 = vpop.permute.xlu0 %480 }
 0x1af   : > { %v483_v25 = vpop.permute.xlu1 %482 }
 0x1b1   : > { %v522_v26 = vpop.permute.xlu0 %521 }
 0x1b3   : > { %v524_v33 = vpop.permute.xlu1 %523 }
 0x1b5   : > { %v1693_v30 = vpop.permute.xlu0 %562 }
 0x1b7   : > { %v1695_v36 = vpop.permute.xlu1 %564 }
 0x1b9   : > { %v1697_v38 = vpop.permute.xlu0 %607 }
 0x1bb   : > { %v1699_v40 = vpop.permute.xlu1 %609 }
 0x1bd   : > { %v448_v49 = vpop.permute.xlu0 %447 }
 0x1be   : > { %v454_v55 = vsel %vm451_vm7, %v440_v14, %v448_v49  ;;  %v458_v34 = vsel %vm451_vm7, %v448_v49, %v440_v14 }
 0x1bf   : > { %v450_v57 = vpop.permute.xlu1 %449  ;;  %v464_v0 = vmul.f32 %v1529_v47, %v458_v34  ;;  %v465_v39 = vmul.f32 %v1538_v50, %v454_v55 }
 0x1c0   : > { %v455_v58 = vsel %vm451_vm7, %v442_v18, %v450_v57  ;;  %v459_v54 = vsel %vm451_vm7, %v450_v57, %v442_v18 }
 0x1c1   : > { %v466_v14 = vmul.f32 %v1529_v47, %v459_v54  ;;  %v467_v49 = vmul.f32 %v1538_v50, %v455_v58  ;;  %v653_v20 = vpop.permute.xlu0 %652 }
 0x1c2   : > { %v661_v63 = vsel %vm660_vm15, %v1519_v42, %v653_v20  ;;  %v665_v18 = vsel %vm660_vm15, %v653_v20, %v1519_v42 }
 0x1c3   : > { %v1726_v19 = vmul.f32 %v1713_v1, %v665_v18  ;;  %v655_v57 = vpop.permute.xlu1 %654  ;;  %v471_v34 = vpack.c.bf16 %v467_v49, %v465_v39  ;;  %v470_v46 = vpack.c.bf16 %v466_v14, %v464_v0  ;;  %v1735_v58 = vmul.f32 %v1625_v35, %v661_v63 }
 0x1c4   : > { %v662_v47 = vsel %vm660_vm15, %v1521_v43, %v655_v57  ;;  %v666_v55 = vsel %vm660_vm15, %v655_v57, %v1521_v43 }
 0x1c5   : > { %v1738_v54 = vmul.f32 %v1625_v35, %v662_v47  ;;  %v1741_v42 = vmul.f32 %v1713_v1, %v666_v55  ;;  %874 = vmatprep.subr.bf16.mxu1 %v471_v34  ;;  %v489_v20 = vpop.permute.xlu0 %488 }
 0x1c6   : > { %v499_v0 = vsel %vm492_vm8, %v489_v20, %v481_v21  ;;  %875 = vmatpush1.bf16.msra.mxu1 %v470_v46  ;;  %v495_v14 = vsel %vm492_vm8, %v481_v21, %v489_v20 }
 0x1c7   : > { %v491_v39 = vpop.permute.xlu1 %490  ;;  %876 = vmatprep.subr.bf16.mxu1 %v510_v12  ;;  %v678_v43 = vpack.c.bf16 %v1741_v42, %v1726_v19  ;;  %v677_v63 = vpack.c.bf16 %v1738_v54, %v1735_v58  ;;  %v505_v18 = vmul.f32 %v1556_v61, %v499_v0 }
 0x1c8   : > { %v496_v49 = vsel %vm492_vm8, %v483_v25, %v491_v39  ;;  %v500_v46 = vsel %vm492_vm8, %v491_v39, %v483_v25 }
 0x1c9   : > { %v507_v5 = vmul.f32 %v1556_v61, %v500_v46  ;;  %v512_v6 = vpack.c.bf16 %v496_v49, %v495_v14  ;;  %v530_v12 = vpop.permute.xlu0 %529 }
 0x1ca   : > { %877 = vmatpush1.bf16.msra.mxu1 %v509_v24  ;;  %v536_v47 = vsel %vm533_vm12, %v522_v26, %v530_v12  ;;  %v540_v25 = vsel %vm533_vm12, %v530_v12, %v522_v26 }
 0x1cb   : > { %v1763_v57 = vpop.permute.xlu1 %650  ;;  %878 = vmatprep.subr.bf16.mxu1 %v512_v6  ;;  %v511_v21 = vpack.c.bf16 %v507_v5, %v505_v18  ;;  %v546_v10 = vmul.f32 %v1590_v16, %v540_v25  ;;  %v547_v24 = vmul.f32 %v1595_v17, %v536_v47 }
 0x1cd   : > { %v571_v34 = vpop.permute.xlu0 %570 }
 0x1ce   : > { %879 = vmatpush1.bf16.msra.mxu1 %v511_v21 }
 0x1cf   : > { %v532_v55 = vpop.permute.xlu1 %531  ;;  %880 = vmatprep.subr.bf16.mxu1 %v551_v45 }
 0x1d0   : > { %v537_v61 = vsel %vm533_vm12, %v524_v33, %v532_v55  ;;  %v541_v8 = vsel %vm533_vm12, %v532_v55, %v524_v33  ;;  %v577_v33 = vsel %vm574_vm13, %v1693_v30, %v571_v34 }
 0x1d1   : > { %v548_v20 = vmul.f32 %v1590_v16, %v541_v8  ;;  %v549_v26 = vmul.f32 %v1595_v17, %v537_v61  ;;  %v616_v0 = vpop.permute.xlu0 %615  ;;  %v581_v16 = vsel %vm574_vm13, %v571_v34, %v1693_v30  ;;  %v588_v49 = vmul.f32 %v1538_v50, %v577_v33 }
 0x1d2   : > { %881 = vmatpush1.bf16.msra.mxu1 %v550_v48  ;;  %v587_v48 = vmul.f32 %v1625_v35, %v581_v16  ;;  %v433_v34 = vpack.c.bf16 %v1395_v13, %v1390_v11  ;;  %v622_v25 = vsel %vm619_vm14, %v1697_v38, %v616_v0  ;;  %v626_v55 = vsel %vm619_vm14, %v616_v0, %v1697_v38 }
 0x1d3   : > { %v1783_v28 = vpop.permute.xlu1 %687  ;;  %v553_v31 = vpack.c.bf16 %v549_v26, %v547_v24  ;;  %v552_v45 = vpack.c.bf16 %v548_v20, %v546_v10  ;;  %v2006_v61 = vmov 0.0   ;;  %v2007_v20 = vpack.c.bf16 %v1687_v7, %v1681_v37 }
 0x1d4   : > { %v1835_v3 = vsel %vm274_vm0, 1.0, %v2006_v61  ;;  %v632_v0 = vmul.f32 %v1659_v56, %v622_v25 }
 0x1d5   : > { %882 = vmatprep.subr.bf16.mxu1 %v553_v31  ;;  %v1785_v39 = vpop.permute.xlu0 %648  ;;  %v633_v31 = vmul.f32 %v1595_v17, %v626_v55 }
 0x1d6   : > { %883 = vmatpush1.bf16.msra.mxu1 %v552_v45 }
 0x1d7   : > { %v573_v14 = vpop.permute.xlu1 %572  ;;  %884 = vmatprep.subr.bf16.mxu1 %v592_v60 }
 0x1d8   : > { %v578_v27 = vsel %vm574_vm13, %v1695_v36, %v573_v14  ;;  %v582_v29 = vsel %vm574_vm13, %v573_v14, %v1695_v36  ;;  %v432_v36 = vpack.c.bf16 %v1367_v62, %v1363_v59 }
 0x1d9   : > { %v589_v30 = vmul.f32 %v1625_v35, %v582_v29  ;;  %v590_v46 = vmul.f32 %v1538_v50, %v578_v27  ;;  %v657_v18 = vpop.permute.xlu0 %656  ;;  %v431_v50 = vpack.c.bf16 %v1333_v44, %v1331_v41 }
 0x1da   : > { %885 = vmatpush1.bf16.msra.mxu1 %v2005_v32 }
 0x1db   : > { %v1809_v53 = vpop.permute.xlu1 %695  ;;  %v594_v60 = vpack.c.bf16 %v590_v46, %v588_v49  ;;  %v593_v5 = vpack.c.bf16 %v589_v30, %v587_v48  ;;  %v663_v46 = vsel %vm660_vm15, %v1785_v39, %v657_v18 }
 0x1dd   : > { %886 = vmatprep.subr.bf16.mxu1 %v594_v60  ;;  %v1811_v6 = vpop.permute.xlu0 %685 }
 0x1de   : > { %887 = vmatpush1.bf16.msra.mxu1 %v593_v5 }
 0x1df   : > { %v729_v12 = vpop.permute.xlu1 %728  ;;  %888 = vmatprep.subr.bf16.mxu1 %v432_v36  ;;  %v1117_v36 = vsel %vm234_vm2, 1.0, %v2006_v61  ;;  %vm865_vm2 = vcmask 261120  }
 0x1e1   : > { %v1817_v21 = vpop.permute.xlu0 %693 }
 0x1e2   : > { %889 = vmatpush1.bf16.msra.mxu1 %v431_v50  ;;  %v673_v50 = vmul.f32 %v1625_v35, %v663_v46 }
 0x1e3   : > { %v737_v52 = vpop.permute.xlu1 %736  ;;  %890 = vmatprep.subr.bf16.mxu1 %v434_v51 }
 0x1e4   : > { %v744_v8 = vsel %vm742_vm1, %v729_v12, %v737_v52  ;;  %v748_v10 = vsel %vm742_vm1, %v737_v52, %v729_v12 }
 0x1e5   : > { %v727_v47 = vpop.permute.xlu0 %726  ;;  %v753_v37 = vmul.f32 %v1659_v56, %v744_v8  ;;  %v754_v7 = vmul.f32 %v1835_v3, %v748_v10 }
 0x1e6   : > { %891 = vmatpush1.bf16.msra.mxu1 %v433_v34 }
 0x1e7   : > { %v618_v24 = vpop.permute.xlu1 %617  ;;  %892 = vmatprep.subr.bf16.mxu1 %v2007_v20 }
 0x1e8   : > { %v623_v26 = vsel %vm619_vm14, %v1699_v40, %v618_v24  ;;  %v627_v38 = vsel %vm619_vm14, %v618_v24, %v1699_v40  ;;  %v2008_v40 = vpack.c.bf16 %v1684_v4, %v1678_v2  ;;  %v667_v2 = vsel %vm660_vm15, %v657_v18, %v1785_v39 }
 0x1e9   : > { %v634_v45 = vmul.f32 %v1659_v56, %v623_v26  ;;  %v635_v33 = vmul.f32 %v1595_v17, %v627_v38  ;;  %v735_v16 = vpop.permute.xlu0 %734  ;;  %v706_v4 = vsel %vm701_vm3, %v1817_v21, %v1811_v6  ;;  %v707_v39 = vsel %vm701_vm3, %v1809_v53, %v1783_v28 }
 0x1ea   : > { %v743_v14 = vsel %vm742_vm1, %v727_v47, %v735_v16  ;;  %v747_v27 = vsel %vm742_vm1, %v735_v16, %v727_v47  ;;  %893 = vmatpush1.bf16.msra.mxu1 %v2008_v40  ;;  %v674_v19 = vmul.f32 %v1713_v1, %v667_v2  ;;  %v711_v42 = vmul.f32 %v1117_v36, %v706_v4 }
 0x1eb   : > { %v751_v29 = vmul.f32 %v1659_v56, %v743_v14  ;;  %v752_v48 = vmul.f32 %v1835_v3, %v747_v27  ;;  %v692_v17 = vpop.permute.xlu1 %691  ;;  %v639_v49 = vpack.c.bf16 %v635_v33, %v633_v31  ;;  %v638_v30 = vpack.c.bf16 %v634_v45, %v632_v0  ;;  %v1174_v14 = vld [vmem:[%s1989_s3] ss:$12 sps:$4 sm:$0xff]   ;;  %v1178_v27 = vld [vmem:[%s1989_s3 + $0x1c] ss:$12 sps:$4 sm:$0xff]  }
 0x1ec   : > { %v713_v34 = vmul.f32 %v1117_v36, %v707_v39 }
 0x1ed   : > { %v759_v32 = vpack.c.bf16 %v753_v37, %v751_v29  ;;  %v690_v60 = vpop.permute.xlu0 %689  ;;  %894 = vmatprep.subr.bf16.mxu1 %v639_v49  ;;  %v760_v5 = vpack.c.bf16 %v754_v7, %v752_v48  ;;  %v2009_v29 = vmov 0   ;;  %v1181_v48 = vld [vmem:[%s1989_s3 + $0x20] ss:$12 sps:$4 sm:$0xff]  }
 0x1ee   : > { %895 = vmatpush1.bf16.msra.mxu1 %v638_v30  ;;  %v719_v8 = vpack.c.bf16 %v713_v34, %v711_v42 }
 0x1ef   : > { %v659_v12 = vpop.permute.xlu1 %658  ;;  %896 = vmatprep.subr.bf16.mxu1 %v678_v43  ;;  %925 = vmatprep.subr.bf16.mxu0 %v760_v5 }
 0x1f0   : > { %v664_v18 = vsel %vm660_vm15, %v1763_v57, %v659_v12  ;;  %v668_v15 = vsel %vm660_vm15, %v659_v12, %v1763_v57  ;;  %926 = vmatpush1.bf16.msra.mxu0 %v759_v32  ;;  %v702_v57 = vsel %vm701_vm3, %v1811_v6, %v1817_v21 }
 0x1f1   : > { %v675_v43 = vmul.f32 %v1625_v35, %v664_v18  ;;  %v676_v51 = vmul.f32 %v1713_v1, %v668_v15  ;;  %v698_v52 = vpop.permute.xlu0 %697  ;;  %v703_v1 = vsel %vm701_vm3, %v1783_v28, %v1809_v53 }
 0x1f2   : > { %897 = vmatpush1.bf16.msra.mxu1 %v677_v63  ;;  %v708_v35 = vsel %vm701_vm3, %v698_v52, %v690_v60  ;;  %v718_v54 = vpack.c.bf16 %v703_v1, %v702_v57  ;;  %v704_v28 = vsel %vm701_vm3, %v690_v60, %v698_v52 }
 0x1f3   : > { %v733_v47 = vpop.permute.xlu1 %732  ;;  %v680_v25 = vpack.c.bf16 %v676_v51, %v674_v19  ;;  %v679_v55 = vpack.c.bf16 %v675_v43, %v673_v50  ;;  %v715_v10 = vmul.f32 %v1117_v36, %v708_v35 }
 0x1f5   : > { %v731_v61 = vpop.permute.xlu0 %730  ;;  %898 = vmatprep.subr.bf16.mxu1 %v680_v25 }
 0x1f6   : > { %899 = vmatpush1.bf16.msra.mxu1 %v679_v55 }
 0x1f7   : > { %v700_v58 = vpop.permute.xlu1 %699  ;;  %900 = vmatprep.subr.bf16.mxu1 %v719_v8 }
 0x1f8   : > { %v709_v63 = vsel %vm701_vm3, %v700_v58, %v692_v17  ;;  %v705_v6 = vsel %vm701_vm3, %v692_v17, %v700_v58 }
 0x1f9   : > { %v717_v21 = vmul.f32 %v1117_v36, %v709_v63  ;;  %v739_v24 = vpop.permute.xlu0 %738  ;;  %v720_v0 = vpack.c.bf16 %v705_v6, %v704_v28 }
 0x1fa   : > { %v745_v20 = vsel %vm742_vm1, %v731_v61, %v739_v24  ;;  %v749_v26 = vsel %vm742_vm1, %v739_v24, %v731_v61  ;;  %901 = vmatpush1.bf16.msra.mxu1 %v718_v54 }
 0x1fb   : > { %v741_v53 = vpop.permute.xlu1 %740  ;;  %v721_v38 = vpack.c.bf16 %v717_v21, %v715_v10  ;;  %v755_v33 = vmul.f32 %v1659_v56, %v745_v20  ;;  %v756_v16 = vmul.f32 %v1835_v3, %v749_v26 }
 0x1fc   : > { %v746_v31 = vsel %vm742_vm1, %v733_v47, %v741_v53  ;;  %v750_v45 = vsel %vm742_vm1, %v741_v53, %v733_v47 }
 0x1fd   : > { %v757_v37 = vmul.f32 %v1659_v56, %v746_v31  ;;  %v758_v7 = vmul.f32 %v1835_v3, %v750_v45  ;;  %902 = vmatprep.subr.bf16.mxu1 %v721_v38  ;;  %v1177_v56 = vld [vmem:[%s1989_s3 + $0x8] ss:$12 sps:$4 sm:$0xff]   ;;  %v1180_v3 = vld [vmem:[%s1989_s3 + $0x18] ss:$12 sps:$4 sm:$0xff]  }
 0x1fe   : > { %903 = vmatpush1.bf16.msra.mxu1 %v720_v0 }
 0x1ff   : > { %v761_v9 = vpack.c.bf16 %v757_v37, %v755_v33  ;;  %v762_v40 = vpack.c.bf16 %v758_v7, %v756_v16 }
 0x201   : > { %905 = vmatmul.mubr.bf16.vlgmr.msra.gmra.mrb[0].mxu1 %v1174_v14  ;;  %927 = vmatprep.subr.bf16.mxu0 %v762_v40 }
 0x202   : > { %928 = vmatpush1.bf16.msra.mxu0 %v761_v9  ;;  %914 = vmatprep.mubr.bf16.mxu1 %v1178_v27 }
 0x205   : > { %1130 = vmatmul.mubr.msk.bf16.vlgmr.msra.gmra.mrb[8].mxu0 %vm865_vm2, %v1177_v56 }
 0x206   : > { %967 = vmatprep.mubr.bf16.mxu0 %v2009_v29 }
 0x209   : > { %915 = vmatmul.mubr.bf16.gmra.mrb[4].mxu1 %v1180_v3 }
 0x20a   : > { %v818_v30 = vpop.permute.xlu0 %817 }
 0x20c   : > { %v823_v5 = vpop.permute.xlu1 %822 }
 0x20d   : > { %1131 = vmatmul.mubr.msk.bf16.gmra.mrb[12].mxu0 %vm865_vm2, %v1181_v48 }
 0x20e   : > { %v828_v57 = vpop.permute.xlu0 %827 }
 0x210   : > { %v833_v63 = vpop.permute.xlu1 %832 }
 0x2d4   : > { %v906_v17 = vpop.f32.mrb[0].mxu1 }
 0x2d5   : > { %v908_v49 = vpop.f32.mrb[1].mxu1  ;;  %v907_v32 = vadd.f32 %v906_v17, %v818_v30 }
 0x2d6   : > { %v910_v46 = vpop.f32.mrb[2].mxu1  ;;  %v909_v2 = vadd.f32 %v908_v49, %v818_v30 }
 0x2d7   : > { %v912_v60 = vpop.f32.mrb[3].mxu1  ;;  %v911_v36 = vadd.f32 %v910_v46, %v823_v5 }
 0x2d8   : > { %v959_v4 = vpop.f32.mrb[8].mxu0  ;;  %v913_v39 = vadd.f32 %v912_v60, %v823_v5 }
 0x2d9   : > { %v1943_v12 = vadd.f32 %v959_v4, %v907_v32  ;;  %v961_v50 = vpop.f32.mrb[9].mxu0 }
 0x2da   : > { %v1945_v18 = vadd.f32 %v961_v50, %v909_v2  ;;  %v963_v15 = vpop.f32.mrb[10].mxu0 }
 0x2db   : > { %v978_v19 = vsub.f32 0.0, %v1943_v12  ;;  %v1948_v42 = vadd.f32 %v963_v15, %v911_v36  ;;  %v965_v43 = vpop.f32.mrb[11].mxu0 }
 0x2dc   : > { %v979_v51 = vsub.f32 0.0, %v1945_v18  ;;  %v1951_v52 = vadd.f32 %v965_v43, %v913_v39  ;;  %v916_v34 = vpop.f32.mrb[4].mxu1 }
 0x2dd   : > { %v986_v47 = vmul.f32 1.442695, %v978_v19  ;;  %v980_v25 = vsub.f32 0.0, %v1948_v42  ;;  %v918_v55 = vpop.f32.mrb[5].mxu1  ;;  %v917_v58 = vadd.f32 %v916_v34, %v828_v57 }
 0x2de   : > { %v988_v61 = vmul.f32 1.442695, %v979_v51  ;;  %v981_v8 = vsub.f32 0.0, %v1951_v52  ;;  %v920_v35 = vpop.f32.mrb[6].mxu1  ;;  %v919_v6 = vadd.f32 %v918_v55, %v828_v57 }
 0x2df   : > { %1214 = vpow2.f32 %v986_v47  ;;  %v990_v1 = vmul.f32 1.442695, %v980_v25  ;;  %v922_v54 = vpop.f32.mrb[7].mxu1  ;;  %v921_v24 = vadd.f32 %v920_v35, %v833_v63 }
 0x2e0   : > { %1216 = vpow2.f32 %v988_v61  ;;  %v992_v10 = vmul.f32 1.442695, %v981_v8  ;;  %v969_v21 = vpop.f32.mrb[12].mxu0  ;;  %v923_v28 = vadd.f32 %v922_v54, %v833_v63 }
 0x2e1   : > { %1218 = vpow2.f32 %v990_v1  ;;  %v1955_v20 = vadd.f32 %v969_v21, %v917_v58  ;;  %v971_v26 = vpop.f32.mrb[13].mxu0 }
 0x2e2   : > { %1220 = vpow2.f32 %v992_v10  ;;  %v1957_v53 = vadd.f32 %v971_v26, %v919_v6  ;;  %v973_v38 = vpop.f32.mrb[14].mxu0 }
 0x2e3   : > { %v982_v0 = vsub.f32 0.0, %v1955_v20  ;;  %v1960_v31 = vadd.f32 %v973_v38, %v921_v24  ;;  %v975_v45 = vpop.f32.mrb[15].mxu0 }
 0x2e4   : > { %v983_v33 = vsub.f32 0.0, %v1957_v53  ;;  %v976_v16 = vadd.f32 %v975_v45, %v923_v28 }
 0x2e5   : > { %v994_v37 = vmul.f32 1.442695, %v982_v0  ;;  %v984_v7 = vsub.f32 0.0, %v1960_v31 }
 0x2e6   : > { %v996_v14 = vmul.f32 1.442695, %v983_v33  ;;  %v985_v27 = vsub.f32 0.0, %v976_v16 }
 0x2e7   : > { %1222 = vpow2.f32 %v994_v37  ;;  %v998_v9 = vmul.f32 1.442695, %v984_v7 }
 0x2e8   : > { %1224 = vpow2.f32 %v996_v14  ;;  %v1000_v40 = vmul.f32 1.442695, %v985_v27 }
 0x2e9   : > { %v1215_v56 = vpop.eup %1214  ;;  %1226 = vpow2.f32 %v998_v9 }
 0x2ea   : > { %v1217_v3 = vpop.eup %1216  ;;  %v1002_v29 = vadd.f32 1.0, %v1215_v56  ;;  %1228 = vpow2.f32 %v1000_v40 }
 0x2eb   : > { %v1219_v48 = vpop.eup %1218  ;;  %v1003_v17 = vadd.f32 1.0, %v1217_v3 }
 0x2ec   : > { %v1221_v49 = vpop.eup %1220  ;;  %1230 = vrcp.f32 %v1002_v29  ;;  %v1004_v30 = vadd.f32 1.0, %v1219_v48 }
 0x2ed   : > { %1232 = vrcp.f32 %v1003_v17  ;;  %v1005_v46 = vadd.f32 1.0, %v1221_v49 }
 0x2ee   : > { %1234 = vrcp.f32 %v1004_v30 }
 0x2ef   : > { %1236 = vrcp.f32 %v1005_v46 }
 0x2f1   : > { %v1223_v32 = vpop.eup %1222 }
 0x2f2   : > { %v1225_v60 = vpop.eup %1224  ;;  %v1006_v5 = vadd.f32 1.0, %v1223_v32 }
 0x2f3   : > { %v1227_v2 = vpop.eup %1226  ;;  %v1007_v4 = vadd.f32 1.0, %v1225_v60 }
 0x2f4   : > { %v1229_v36 = vpop.eup %1228  ;;  %1238 = vrcp.f32 %v1006_v5  ;;  %v1008_v50 = vadd.f32 1.0, %v1227_v2 }
 0x2f5   : > { %1240 = vrcp.f32 %v1007_v4  ;;  %v1009_v39 = vadd.f32 1.0, %v1229_v36 }
 0x2f6   : > { %v1231_v15 = vpop.eup %1230  ;;  %1242 = vrcp.f32 %v1008_v50 }
 0x2f7   : > { %v1233_v19 = vpop.eup %1232  ;;  %v1018_v43 = vmul.f32 %v1231_v15, %v1943_v12  ;;  %1244 = vrcp.f32 %v1009_v39 }
 0x2f8   : > { %v1235_v51 = vpop.eup %1234  ;;  %v1019_v34 = vmul.f32 %v1233_v19, %v1945_v18 }
 0x2f9   : > { %v1237_v47 = vpop.eup %1236  ;;  %v1026_v25 = vadd.f32 %v1018_v43, %v1331_v41  ;;  %v1020_v55 = vmul.f32 %v1235_v51, %v1948_v42 }
 0x2fa   : > { %v1027_v57 = vadd.f32 %v1019_v34, %v1363_v59  ;;  %v1021_v61 = vmul.f32 %v1237_v47, %v1951_v52 }
 0x2fb   : > { %1034 = vst [vmem:[%s224_s21] sm:$0xff] %v1026_v25  ;;  %v1028_v12 = vadd.f32 %v1020_v55, %v1333_v44 }
 0x2fc   : > { %1035 = vst [vmem:[%s224_s21 + $0x8] sm:$0xff] %v1027_v57  ;;  %v1029_v8 = vadd.f32 %v1021_v61, %v1367_v62 }
 0x2fd   : > { %1036 = vst [vmem:[%s224_s21 + $0x10] sm:$0xff] %v1028_v12 }
 0x2fe   : > { %v1239_v35 = vpop.eup %1238  ;;  %1037 = vst [vmem:[%s224_s21 + $0x18] sm:$0xff] %v1029_v8 }
 0x2ff   : > { %v1241_v1 = vpop.eup %1240  ;;  %v1022_v18 = vmul.f32 %v1239_v35, %v1955_v20 }
 0x300   : > { %v1243_v58 = vpop.eup %1242  ;;  %v1023_v41 = vmul.f32 %v1241_v1, %v1957_v53 }
 0x301   : > { %v1245_v42 = vpop.eup %1244  ;;  %v1030_v59 = vadd.f32 %v1022_v18, %v1390_v11  ;;  %v1024_v52 = vmul.f32 %v1243_v58, %v1960_v31 }
 0x302   : > { %v1031_v54 = vadd.f32 %v1023_v41, %v1434_v22  ;;  %v1025_v44 = vmul.f32 %v1245_v42, %v976_v16 }
 0x303   : > { %1038 = vst [vmem:[%s224_s21 + $0x20] sm:$0xff] %v1030_v59  ;;  %v1032_v62 = vadd.f32 %v1024_v52, %v1395_v13 }
 0x304   : > { %1039 = vst [vmem:[%s224_s21 + $0x28] sm:$0xff] %v1031_v54  ;;  %v1033_v63 = vadd.f32 %v1025_v44, %v1438_v23 }
 0x305   : > { %1040 = vst [vmem:[%s224_s21 + $0x30] sm:$0xff] %v1032_v62 }
 0x306   : > { %1041 = vst [vmem:[%s224_s21 + $0x38] sm:$0xff] %v1033_v63 }
 0x307 PF: > { %s15_s18 = sadd.s32 1, %s1252_s18  }
 0x308   : > { %p12_p4 = scmp.ge.s32.totalorder %s15_s18, 4  }
 0x30a   :  { %14 = sbr.rel (!%p12_p4) target bundleno = 1 (0x1), region = 70 }

</bundles_post_ra>
